<compile_context>
chip_gen: v7x
topology: tpu7x:2x2x1
jax: 0.10.0
libtpu: 0.0.40
codegen_flags: <defaults>
</compile_context>

<pallas_src>
import jax
import jax.numpy as jnp
from jax.experimental import pallas as pl
from jax.experimental.pallas import tpu as pltpu

_LANE = 128
_SUBLANE = 8


def _mean_readout_kernel(x_ref, w1_ref, b1_ref, w2_ref, b2_ref, o_ref):
    """x_ref: [L, tile_n, D] -- last time step already selected by the BlockSpec.

    The mean's 1/L is folded into w1 by the wrapper, so only a sum over L is
    needed here.  Dots run in the input dtype on the MXU with f32 accumulation;
    bias adds and SiLU happen in f32 (sigmoid goes to the EUP slot).
    """
    y = jnp.sum(x_ref[...], axis=0)                                    # [tile_n, D]

    h = jnp.dot(y, w1_ref[...], preferred_element_type=jnp.float32)   # [tile_n, D] f32
    h = h + b1_ref[...].astype(jnp.float32)
    h = h * jax.nn.sigmoid(h)                                          # SiLU

    o = jnp.dot(h.astype(w2_ref.dtype), w2_ref[...],
                preferred_element_type=jnp.float32)                    # [tile_n, Dout_pad]
    o = o + b2_ref[...].astype(jnp.float32)
    o_ref[...] = o.astype(o_ref.dtype)


def mean_readout_pallas(x, w1, b1, w2, b2, *, tile_n=None,
                        vmem_budget_bytes=8 * 1024 * 1024,
                        vmem_limit_bytes=None):
    """x: [..., L, T, N, D] -> fc(mean_L(x[..., -1, :, :])) with shape [..., N, Dout]."""
    *lead, L, T, N, D = x.shape
    Dout = w2.shape[1]
    B = 1
    for s in lead:
        B *= s
    # Flattening only the *leading* dims is free (no transpose / no data movement);
    # the layer (L) and time (T) axes are handled entirely by the BlockSpec, so no
    # [L, M, D] copy is ever materialized in HBM.
    x5 = x.reshape(B, L, T, N, D)

    # Fold the mean into the first weight:  sum_L(x) @ (w1 / L) == mean_L(x) @ w1.
    w1s = (w1 * (1.0 / L)).astype(w1.dtype)

    # Lane-dense output: pad Dout up to a multiple of 128 so the store path uses
    # full-width vst; the padding is sliced off after the call.
    d_out_pad = ((Dout + _LANE - 1) // _LANE) * _LANE
    if d_out_pad != Dout:
        w2p = jnp.pad(w2, ((0, 0), (0, d_out_pad - Dout)))
        b2p = jnp.pad(b2, ((0, 0), (0, d_out_pad - Dout)))
    else:
        w2p, b2p = w2, b2

    # Node tile: as many rows as possible (amortizes ~0.35us/step overhead and
    # fills the MXU M dim) while the double-buffered input block stays inside a
    # VMEM budget that fits comfortably on all of v5e / v6e / v7x.
    if tile_n is None:
        bytes_per_row = 2 * L * D * jnp.dtype(x.dtype).itemsize   # double-buffered
        max_rows = max(_SUBLANE, vmem_budget_bytes // max(bytes_per_row, 1))
        if N <= max_rows:
            tile_n = N                                # full axis: always layout-legal
        else:
            tile_n = min((max_rows // _SUBLANE) * _SUBLANE, 1024)
    n_tiles = pl.cdiv(N, tile_n)                       # partial tail tile is masked

    t_last = T - 1    # static: select the last time step inside the index_map

    grid_spec = pltpu.PrefetchScalarGridSpec(
        num_scalar_prefetch=0,
        grid=(B, n_tiles),
        in_specs=[
            # [B, L, T, N, D] -> kernel block [L, tile_n, D]; only the T-1 time
            # slice is ever DMA'd; B and T axes are squeezed away.
            pl.BlockSpec((pl.Squeezed(), L, pl.Squeezed(), tile_n, D),
                         lambda b, n: (b, 0, t_last, n, 0)),
            pl.BlockSpec((D, D),         lambda b, n: (0, 0)),
            pl.BlockSpec((1, D),         lambda b, n: (0, 0)),
            pl.BlockSpec((D, d_out_pad), lambda b, n: (0, 0)),
            pl.BlockSpec((1, d_out_pad), lambda b, n: (0, 0)),
        ],
        out_specs=pl.BlockSpec((pl.Squeezed(), tile_n, d_out_pad),
                               lambda b, n: (b, n, 0)),
    )

    out = pl.pallas_call(
        _mean_readout_kernel,
        out_shape=jax.ShapeDtypeStruct((B, N, d_out_pad), x.dtype),
        grid_spec=grid_spec,
        compiler_params=pltpu.CompilerParams(
            # Both axes independent -> megacore sharding on v7x; no-op on v5e/v6e.
            dimension_semantics=("parallel", "parallel"),
            vmem_limit_bytes=vmem_limit_bytes,
        ),
    )(x5, w1s, b1, w2p, b2p)

    out = out[..., :Dout]
    return out.reshape(*lead, N, Dout)


def mean_readout_ref(x, w1, b1, w2, b2):
    y = jnp.mean(x[..., -1, :, :], axis=-3)
    h = y @ w1 + b1[0]
    h = h * jax.nn.sigmoid(h)
    return h @ w2 + b2[0]


if __name__ == "__main__":
    # Small shapes: batch=2, layers L=3, time T=4, nodes N=8, in=32, out=16
    B, L, T, N, D, Dout = 2, 3, 4, 8, 32, 16

    key = jax.random.PRNGKey(0)
    kx, k1, k2, k3, k4 = jax.random.split(key, 5)

    x = jax.random.normal(kx, (B, L, T, N, D), dtype=jnp.float32)
    w1 = jax.random.normal(k1, (D, D), dtype=jnp.float32) / jnp.sqrt(D)
    b1 = jax.random.normal(k2, (1, D), dtype=jnp.float32) * 0.01
    w2 = jax.random.normal(k3, (D, Dout), dtype=jnp.float32) / jnp.sqrt(D)
    b2 = jax.random.normal(k4, (1, Dout), dtype=jnp.float32) * 0.01

    out = mean_readout_pallas(x, w1, b1, w2, b2)
    out = jax.block_until_ready(out)

    ref = mean_readout_ref(x, w1, b1, w2, b2)
    assert out.shape == (B, N, Dout), out.shape
    assert jnp.allclose(out, ref, atol=1e-5, rtol=1e-5), "mismatch vs reference"

    print("KERNEL_OK")
</pallas_src>

<mosaic_0001>
module attributes {stable_mosaic.version = 11 : i64} {
  func.func @_mean_readout_kernel(%arg0: i32, %arg1: i32, %arg2: memref<1x3x1x8x32xf32, #tpu.memory_space<vmem>>, %arg3: memref<32x32xf32, #tpu.memory_space<vmem>>, %arg4: memref<1x32xf32, #tpu.memory_space<vmem>>, %arg5: memref<32x128xf32, #tpu.memory_space<vmem>>, %arg6: memref<1x128xf32, #tpu.memory_space<vmem>>, %arg7: memref<1x8x128xf32, #tpu.memory_space<vmem>>) attributes {dimension_semantics = [#tpu.dimension_semantics<parallel>, #tpu.dimension_semantics<parallel>], iteration_bounds = array<i64: 2, 1>, scalar_prefetch = 0 : i64, scratch_operands = 0 : i64, tpu.core_type = #tpu.core_type<tc>, window_params = [{transform_indices = @transform_0, window_bounds = array<i64: 1, 3, 1, 8, 32>}, {pipeline_mode = #tpu.pipeline_mode<synchronous>, transform_indices = @transform_1, window_bounds = array<i64: 32, 32>}, {pipeline_mode = #tpu.pipeline_mode<synchronous>, transform_indices = @transform_2, window_bounds = array<i64: 1, 32>}, {pipeline_mode = #tpu.pipeline_mode<synchronous>, transform_indices = @transform_3, window_bounds = array<i64: 32, 128>}, {pipeline_mode = #tpu.pipeline_mode<synchronous>, transform_indices = @transform_4, window_bounds = array<i64: 1, 128>}, {transform_indices = @transform_5, window_bounds = array<i64: 1, 8, 128>}]} {
    %c0 = arith.constant 0 : index
    %c0_0 = arith.constant 0 : index
    %c0_1 = arith.constant 0 : index
    %c0_2 = arith.constant 0 : index
    %c0_3 = arith.constant 0 : index
    %0 = vector.load %arg2[%c0, %c0_0, %c0_1, %c0_2, %c0_3] : memref<1x3x1x8x32xf32, #tpu.memory_space<vmem>>, vector<1x3x1x8x32xf32>
    %1 = vector.shape_cast %0 : vector<1x3x1x8x32xf32> to vector<3x8x32xf32>
    %cst = arith.constant dense<0.000000e+00> : vector<8x32xf32>
    %2 = vector.multi_reduction <add>, %1, %cst [0] : vector<3x8x32xf32> to vector<8x32xf32>
    %c0_4 = arith.constant 0 : index
    %c0_5 = arith.constant 0 : index
    %3 = vector.load %arg3[%c0_4, %c0_5] : memref<32x32xf32, #tpu.memory_space<vmem>>, vector<32x32xf32>
    %cst_6 = arith.constant dense<0.000000e+00> : vector<8x32xf32>
    %4 = tpu.matmul %2, %3, %cst_6 {dimension_numbers = #tpu.dot_dimension_numbers<[1], [0], [0], [1], [0, 0, 1, 1], [], []>} : vector<8x32xf32>, vector<32x32xf32>, vector<8x32xf32> -> vector<8x32xf32>
    %c0_7 = arith.constant 0 : index
    %c0_8 = arith.constant 0 : index
    %5 = vector.load %arg4[%c0_7, %c0_8] : memref<1x32xf32, #tpu.memory_space<vmem>>, vector<1x32xf32>
    %6 = vector.broadcast %5 : vector<1x32xf32> to vector<8x32xf32>
    %7 = arith.addf %4, %6 : vector<8x32xf32>
    %8 = arith.negf %7 : vector<8x32xf32>
    %9 = math.exp %8 : vector<8x32xf32>
    %cst_9 = arith.constant 1.000000e+00 : f32
    %10 = vector.broadcast %cst_9 : f32 to vector<8x32xf32>
    %11 = arith.addf %10, %9 : vector<8x32xf32>
    %12 = arith.divf %10, %11 : vector<8x32xf32>
    %13 = arith.mulf %7, %12 : vector<8x32xf32>
    %c0_10 = arith.constant 0 : index
    %c0_11 = arith.constant 0 : index
    %14 = vector.load %arg5[%c0_10, %c0_11] : memref<32x128xf32, #tpu.memory_space<vmem>>, vector<32x128xf32>
    %cst_12 = arith.constant dense<0.000000e+00> : vector<8x128xf32>
    %15 = tpu.matmul %13, %14, %cst_12 {dimension_numbers = #tpu.dot_dimension_numbers<[1], [0], [0], [1], [0, 0, 1, 1], [], []>} : vector<8x32xf32>, vector<32x128xf32>, vector<8x128xf32> -> vector<8x128xf32>
    %c0_13 = arith.constant 0 : index
    %c0_14 = arith.constant 0 : index
    %16 = vector.load %arg6[%c0_13, %c0_14] : memref<1x128xf32, #tpu.memory_space<vmem>>, vector<1x128xf32>
    %17 = vector.broadcast %16 : vector<1x128xf32> to vector<8x128xf32>
    %18 = arith.addf %15, %17 : vector<8x128xf32>
    %c0_15 = arith.constant 0 : index
    %c0_16 = arith.constant 0 : index
    %c0_17 = arith.constant 0 : index
    %19 = vector.load %arg7[%c0_15, %c0_16, %c0_17] : memref<1x8x128xf32, #tpu.memory_space<vmem>>, vector<1x8x128xf32>
    %20 = vector.shape_cast %19 : vector<1x8x128xf32> to vector<8x128xf32>
    %21 = vector.shape_cast %18 : vector<8x128xf32> to vector<1x8x128xf32>
    tpu.vector_store %arg7[%c0_15, %c0_16, %c0_17], %21 {strides = array<i32>} : memref<1x8x128xf32, #tpu.memory_space<vmem>>, vector<1x8x128xf32>,
    return
  }
  func.func @transform_0(%arg0: i32, %arg1: i32) -> (i32, i32, i32, i32, i32) {
    %c0_i32 = arith.constant 0 : i32
    %c3_i32 = arith.constant 3 : i32
    %c0_i32_0 = arith.constant 0 : i32
    %c0_i32_1 = arith.constant 0 : i32
    return %arg0, %c0_i32, %c3_i32, %arg1, %c0_i32_0 : i32, i32, i32, i32, i32
  }
  func.func @transform_1(%arg0: i32, %arg1: i32) -> (i32, i32) {
    %c0_i32 = arith.constant 0 : i32
    %c0_i32_0 = arith.constant 0 : i32
    %c0_i32_1 = arith.constant 0 : i32
    return %c0_i32, %c0_i32_0 : i32, i32
  }
  func.func @transform_2(%arg0: i32, %arg1: i32) -> (i32, i32) {
    %c0_i32 = arith.constant 0 : i32
    %c0_i32_0 = arith.constant 0 : i32
    %c0_i32_1 = arith.constant 0 : i32
    return %c0_i32, %c0_i32_0 : i32, i32
  }
  func.func @transform_3(%arg0: i32, %arg1: i32) -> (i32, i32) {
    %c0_i32 = arith.constant 0 : i32
    %c0_i32_0 = arith.constant 0 : i32
    %c0_i32_1 = arith.constant 0 : i32
    return %c0_i32, %c0_i32_0 : i32, i32
  }
  func.func @transform_4(%arg0: i32, %arg1: i32) -> (i32, i32) {
    %c0_i32 = arith.constant 0 : i32
    %c0_i32_0 = arith.constant 0 : i32
    %c0_i32_1 = arith.constant 0 : i32
    return %c0_i32, %c0_i32_0 : i32, i32
  }
  func.func @transform_5(%arg0: i32, %arg1: i32) -> (i32, i32, i32) {
    %c0_i32 = arith.constant 0 : i32
    %c0_i32_0 = arith.constant 0 : i32
    return %arg0, %arg1, %c0_i32 : i32, i32, i32
  }
}

</mosaic_0001>

<bundles_post_ra>
// kernel: tpu_custom_call.1
= control target key start
LH: loop header
LB: loop body
LE: loop exit
PB: predicated region body
PF: predicated region fallthrough
CT: control target
= control target key end

     0   :  { %s1237_s0 = inlined_call_operand.hbm [shape: f32[2,3,4,8,32], index: 0, kind: input, shape index: {}]   ;;  %s1238_s1 = inlined_call_operand.hbm [shape: f32[32,32], index: 1, kind: input, shape index: {}]   ;;  %s1239_s2 = inlined_call_operand.vmem [shape: f32[1,32], index: 2, kind: input, shape index: {}]   ;;  %s1240_s3 = inlined_call_operand.hbm [shape: f32[32,128], index: 3, kind: input, shape index: {}]   ;;  %s1241_s4 = inlined_call_operand.vmem [shape: f32[1,128], index: 4, kind: input, shape index: {}]   ;;  %s1242_s5 = inlined_call_operand.hbm [shape: f32[2,8,128], index: 5, kind: output, shape index: {}]  }
   0x1   :  { %1251 = sst [smem:[#allocation13_spill]] %s1238_s1 }
   0x2   :  { %10 = vsyncpa [#allocation3], 0 }
   0x3   :  { %12 = vsyncpa [#allocation3 + $0x1], 0 }
   0x4   :  { %13 = vsyncpa [#allocation6], 0 }
   0x5   :  { %14 = vsyncpa [#allocation4], 0 }
   0x6   :  { %16 = vsyncpa [#allocation4 + $0x1], 0  ;;  %s965_s18 = smov 0   ;;  %s967_s19 = smov 0  }
   0x7   :  { %s969_s20 = smov 0   ;;  %s971_s21 = smov 0  }
   0x8   :  { %s973_s22 = smov 0   ;;  %s975_s23 = smov 0  }
   0x9 LB: > { %1252 = sst [smem:[#allocation12_spill]] %s923_s23  ;;  %s591_s24 = sadd.s32 4294967295, %s923_s23   ;;  %s923_s23 = sphi %s975_s23, %s22_s23   ;;  %s919_s22 = sphi %s973_s22, %s1275_s22   ;;  %s915_s21 = sphi %s971_s21, %s1274_s21   ;;  %s911_s20 = sphi %s969_s20, %s1273_s20   ;;  %s907_s19 = sphi %s967_s19, %s1272_s19   ;;  %s903_s18 = sphi %s965_s18, %s1271_s18  }
   0xa   : > { %s592_s25 = sadd.s32 4294967294, %s923_s23   ;;  %p50_p0 = scmp.ne.s32.totalorder %s911_s20, %s907_s19 }
   0xb   : > { %p51_p1 = scmp.eq.s32.totalorder %s923_s23, 0  ;;  %p56_p2 = scmp.ne.s32.totalorder %s907_s19, %s903_s18 }
   0xc   : > { %p1003_p3 = scmp.eq.s32.totalorder %s591_s24, 0  ;;  %p166_p4 = scmp.eq.s32.totalorder %s591_s24, 1 }
   0xd   : > { %p1007_p5 = por %p51_p1, %p50_p0  ;;  %p172_p6 = scmp.eq.s32.totalorder %s592_s25, 1 }
   0xe   : > { %s1253_s27 = scalar_select %p1003_p3, 1, 0 }
   0xf   : > { %p1013_p7 = por %p1003_p3, %p56_p2  ;;  %p1017_p8 = por %p166_p4, %p50_p0 }
  0x10   : > { %p1021_p9 = por %p172_p6, %p56_p2  ;;  %p593_p10 = scmp.ge.s32.totalorder %s923_s23, 1 }
  0x11   : > { %s1255_s29 = scalar_select %p1013_p7, 1, 0 }
  0x12   : > { %s1256_s30 = scalar_select %p1017_p8, 1, 0 }
  0x13   : > { %s1257_s6 = scalar_select %p1021_p9, 1, 0 }
  0x14   : > { %p179_p11 = scmp.lt.s32.totalorder %s923_s23, 3  ;;  %s925_s8 = smov [#allocation5]  }
  0x15   : > { %s191_s9 = sshll.u32 %s925_s8, 4  ;;  %p686_p1 = scmp.lt.s32.totalorder %s923_s23, 2  ;;  %s1031_s9 = int_to_ptr.vmem [resolvable:$true] %s191_s9 }
  0x16   : > { %p1027_p12 = pnand %p593_p10, %p179_p11  ;;  %s926_s11 = smov [#allocation7]  }
  0x17   : > { %s207_s12 = sshll.u32 %s926_s11, 4  ;;  %p1045_p4 = pnand %p686_p1, %p1007_p5  ;;  %s1049_s12 = int_to_ptr.vmem [resolvable:$true] %s207_s12 }
  0x18   : > { %p669_p13 = pneg %p1027_p12  ;;  %s1261_s1 = sld [smem:[#allocation13_spill]] }
  0x1a   : > { %p1039_p2 = pnand %p669_p13, %p1003_p3 }
  0x1c   : > { %p752_p10 = pneg %p1039_p2 }
  0x1e   : > { %s750_s16 = scalar_lea.hbm %s1261_s1, 512 }
  0x1f   : > { %p751_p6 = scmp.ne.s32.totalorder %s1261_s1, %s750_s16  ;;  %p757_p5 = scmp.lt.u32.totalorder %s750_s16, %s1261_s1 }
  0x21   : > { %p753_p11 = pnand %p752_p10, %p751_p6 }
  0x23   : > { %p754_p13 = pneg %p753_p11 }
  0x25   : > { %p759_p1 = pnand %p757_p5, %p754_p13 }
  0x27   : > { %762 = shalt.err (!%p759_p1)
}
  0x28   : > { %s763_s8 = scalar_lea.vmem %s1031_s9, 512  ;;  %p771_p3 = scmp.lt.s32.totalorder %s1031_s9, %s1031_s9 }
  0x29   : > { %p764_p0 = scmp.ne.s32.totalorder %s1031_s9, %s763_s8  ;;  %p772_p6 = scmp.lt.s32.totalorder %s763_s8, %s763_s8 }
  0x2b   : > { %p766_p9 = pnand %p764_p0, %p752_p10  ;;  %p773_p11 = por %p772_p6, %p771_p3 }
  0x2d   : > { %p767_p8 = pneg %p766_p9 }
  0x2f   : > { %p774_p7 = pnand %p773_p11, %p767_p8 }
  0x31   : > { %777 = shalt.err (!%p774_p7)
}
  0x32   : > { %s1249_s11 = smov 128   ;;  %s1250_s14 = smov 8  }
  0x33   : > { %672 = dma.hbm_to_vmem [thread:$0]  (!%p1039_p2), %s1261_s1, 512, %s1031_s9, [#allocation6], %s1249_s11, %s1249_s11, %s1250_s14  }
  0x34   : > { %s778_s25 = scalar_lea.hbm %s1240_s3, 512 }
  0x35   : > { %p779_p3 = scmp.ne.s32.totalorder %s1240_s3, %s778_s25  ;;  %p785_p9 = scmp.lt.u32.totalorder %s778_s25, %s1240_s3 }
  0x37   : > { %p781_p7 = pnand %p779_p3, %p752_p10 }
  0x39   : > { %p782_p8 = pneg %p781_p7 }
  0x3b   : > { %p787_p0 = pnand %p785_p9, %p782_p8 }
  0x3d   : > { %790 = shalt.err (!%p787_p0)
}
  0x3e   : > { %s791_s9 = scalar_lea.vmem %s1049_s12, 512  ;;  %p799_p6 = scmp.lt.s32.totalorder %s1049_s12, %s1049_s12 }
  0x3f   : > { %p792_p13 = scmp.ne.s32.totalorder %s1049_s12, %s791_s9  ;;  %p800_p11 = scmp.lt.s32.totalorder %s791_s9, %s791_s9 }
  0x41   : > { %p794_p5 = pnand %p792_p13, %p752_p10  ;;  %p801_p3 = por %p800_p11, %p799_p6 }
  0x43   : > { %p795_p1 = pneg %p794_p5 }
  0x45   : > { %p802_p7 = pnand %p801_p3, %p795_p1 }
  0x47   : > { %805 = shalt.err (!%p802_p7)
}
  0x48   : > { %675 = dma.hbm_to_vmem [thread:$0]  (!%p1039_p2), %s1240_s3, 512, %s1049_s12, [#allocation6], %s1249_s11, %s1249_s11, %s1250_s14  }
  0x49   : > { %s34_s15 = sadd.s32 1, %s919_s22  ;;  %s224_s16 = sand.u32 1, %s911_s20  }
  0x4a   : > { %p36_p10 = scmp.ge.s32.totalorder %s34_s15, 2  ;;  %s655_s10 = smul.u32 24, %s224_s16 }
  0x4b   : > { %s597_s17 = smul.u32 1536, %s919_s22  ;;  %s1262_s12 = sadd.s32 1, %s911_s20 }
  0x4c   : > { %s1277_s15 = smov (%p36_p10, %s34_s15), 0  ;;  %s228_s25 = scalar_lea.vmem [#allocation2], %s655_s10 }
  0x4d   : > { %s38_s24 = ssub.s32 %s919_s22, %s1277_s15  ;;  %s237_s28 = sshll.u32 %s228_s25, 4  ;;  %s1121_s28 = int_to_ptr.vmem [resolvable:$true] %s237_s28 }
  0x4e   : > { %p41_p8 = scmp.eq.s32.totalorder %s38_s24, 0  ;;  %s521_s23 = scalar_lea.hbm %s1237_s0, %s597_s17 }
  0x4f   : > { %s1119_s26 = scalar_lea.hbm %s521_s23, 384  ;;  %s1128_s14 = scalar_lea.sflag [#allocation3], %s224_s16 }
  0x50   : > { %s1126_s11 = scalar_select %p41_p8, %s911_s20, %s1262_s12  }
  0x51   : > { %s836_s1 = scalar_lea.hbm %s521_s23, 768  ;;  %p808_p9 = pneg %p1045_p4 }
  0x52   : > { %p807_p2 = scmp.ne.s32.totalorder %s1119_s26, %s836_s1  ;;  %s811_s24 = scalar_lea.hbm %s1237_s0, 3072 }
  0x53   : > { %p812_p5 = scmp.lt.u32.totalorder %s1119_s26, %s1237_s0  ;;  %p813_p1 = scmp.lt.u32.totalorder %s811_s24, %s836_s1 }
  0x54   : > { %p809_p0 = pnand %p808_p9, %p807_p2  ;;  %p815_p11 = scmp.lt.u32.totalorder %s836_s1, %s1119_s26 }
  0x55   : > { %p814_p6 = por %p813_p1, %p812_p5 }
  0x56   : > { %p810_p13 = pneg %p809_p0 }
  0x57   : > { %p816_p3 = por %p815_p11, %p814_p6 }
  0x59   : > { %p817_p7 = pnand %p816_p3, %p810_p13 }
  0x5b   : > { %820 = shalt.err (!%p817_p7)
}
  0x5c   : > { %s821_s16 = scalar_lea.vmem %s1121_s28, 384  ;;  %s929_s9 = smov [#allocation2]  }
  0x5d   : > { %p822_p10 = scmp.ne.s32.totalorder %s1121_s28, %s821_s16  ;;  %s826_s23 = sshll.u32 %s929_s9, 4  ;;  %s827_s23 = int_to_ptr.vmem [resolvable:$false] %s826_s23 }
  0x5e   : > { %s828_s12 = scalar_lea.vmem %s827_s23, 768  ;;  %p829_p0 = scmp.lt.s32.totalorder %s1121_s28, %s827_s23 }
  0x5f   : > { %p824_p8 = pnand %p822_p10, %p808_p9  ;;  %p830_p5 = scmp.lt.s32.totalorder %s828_s12, %s821_s16 }
  0x61   : > { %p825_p2 = pneg %p824_p8  ;;  %p831_p1 = por %p830_p5, %p829_p0 }
  0x63   : > { %p832_p6 = pnand %p831_p1, %p825_p2 }
  0x65   : > { %835 = shalt.err (!%p832_p6)
}
  0x66   : > { %s930_s1 = smov 512   ;;  %s1263_s10 = smov 8  }
  0x67   : > { %s1264_s17 = smov 128   ;;  %249 = sbr.rel (%p1027_p12) target bundleno = 595 (0x253), region = 40 }
  0x68   : > { %679 = dma.hbm_to_vmem [thread:$0]  (!%p1045_p4), %s1119_s26, 384, %s1121_s28, %s1128_s14, %s930_s1, %s1264_s17, %s1263_s10  }
  0x69   : > { %s1160_s24 = sand.u32 (!%p1027_p12), 1, %s907_s19   ;;  %p1265_p9 = scmp.ne.s32.totalorder (!%p1027_p12), %s1255_s29, 0 }
  0x6a   : > { %s656_s25 = smul.u32 (!%p1027_p12), 24, %s1160_s24  ;;  %s252_s8 = scalar_lea.sflag (!%p1027_p12), [#allocation3], %s1160_s24 }
  0x6c   : > { %s255_s16 = scalar_lea.vmem (!%p1027_p12), [#allocation2], %s656_s25 }
  0x6e   : > { %890 = dma.done.wait (%p1265_p9), %s252_s8, 384  }
  0x6f   : > { %892 = vsyncadd (%p1265_p9), %s252_s8, 4294966912  ;;  %p1266_p13 = scmp.ne.s32.totalorder %s1253_s27, 0 }
  0x71   : > { %894 = dma.done.wait (%p1266_p13), [#allocation6], 1024  }
  0x72   : > { %896 = vsyncadd (%p1266_p13), [#allocation6], 4294966272  ;;  %v931_v0 = vmov 0.0|0.0   ;;  %vm932_vm0 = vmmov 0   ;;  %v933_v1 = vmov 0.0   ;;  %vm293_vm1 = vcmask 261120  }
  0x73   : > { %643 = vmatprep.subr.bf16.mxu0 %v931_v0  ;;  %629 = vmatprep.mubr.msk.f32.mxu0 %vm932_vm0, %v933_v1  ;;  %v299_v2 = vld [vmem:[#allocation5] sm:$0xff]  ;;  %v300_v3 = vld [vmem:[#allocation5 + $0x8] sm:$0xff]  ;;  %v301_v4 = vld [vmem:[#allocation5 + $0x10] sm:$0xff]  ;;  %s601_s7 = sshll.u32 %s1160_s24, 3  ;;  %s608_s28 = sshll.u32 %s915_s21, 7 }
  0x74   : > { %649 = vmatprep.subr.bf16.mxu1 %v931_v0  ;;  %640 = vmatprep.mubr.msk.f32.mxu1 %vm932_vm0, %v933_v1  ;;  %v644_v5 = vpack.c.bf16 %v300_v3, %v299_v2  ;;  %v302_v6 = vld [vmem:[#allocation5 + $0x18] sm:$0xff]  ;;  %v290_v7 = vld [vmem:[%s255_s16] sm:$0xff]  ;;  %v390_v16 = vld [vmem:[#allocation7] sm:$0xff]  ;;  %s289_s26 = scalar_lea.vmem [#allocation8], %s601_s7  ;;  %s1188_s1 = scalar_lea.hbm %s1242_s5, %s608_s28 }
  0x75   : > { %v291_v8 = vld [vmem:[%s255_s16 + $0x8] sm:$0xff]  ;;  %v292_v9 = vld [vmem:[%s255_s16 + $0x10] sm:$0xff]  ;;  %v294_v10 = vsel %vm293_vm1, %v290_v7, 0.0  ;;  %v647_v12 = vpack.c.bf16 %v302_v6, %v301_v4  ;;  %v391_v17 = vld [vmem:[#allocation7 + $0x8] sm:$0xff]  ;;  %s490_s9 = sshll.u32 %s289_s26, 4  ;;  %s476_s10 = scalar_lea.sflag [#allocation4], %s1160_s24  ;;  %s1190_s9 = int_to_ptr.vmem [resolvable:$true] %s490_s9 }
  0x76   : > { %v295_v11 = vsel %vm293_vm1, %v291_v8, 0.0  ;;  %645 = vmatpush3.bf16.msra.mxu0 %v644_v5  ;;  %v297_v14 = vsel %vm293_vm1, %v292_v9, 0.0  ;;  %v650_v18 = vpack.c.bf16 %v391_v17, %v390_v16  ;;  %v392_v19 = vld [vmem:[#allocation7 + $0x10] sm:$0xff]  ;;  %v393_v20 = vld [vmem:[#allocation7 + $0x18] sm:$0xff]  ;;  %s837_s17 = scalar_lea.vmem %s1190_s9, 128  ;;  %p1267_p4 = scmp.ne.s32.totalorder %s1256_s30, 0 }
  0x77   : > { %v296_v13 = vadd.f32 %v295_v11, %v294_v10  ;;  %646 = vmatprep.subr.bf16.mxu0 %v931_v0  ;;  %v653_v21 = vpack.c.bf16 %v393_v20, %v392_v19  ;;  %v602_v22 = vld [vmem:[%s1239_s2] ss:$0 sm:$0xff]  ;;  %p838_p12 = scmp.ne.s32.totalorder %s1190_s9, %s837_s17  ;;  %s934_s21 = smov [#allocation8]  }
  0x78   : > { %651 = vmatpush3.bf16.msra.mxu1 %v650_v18  ;;  %v605_v31 = vld [vmem:[%s1241_s4] ss:$0 sm:$0xff]  ;;  %s841_s25 = sshll.u32 %s934_s21, 4  ;;  %s842_s25 = int_to_ptr.vmem [resolvable:$false] %s841_s25 }
  0x79   : > { %v298_v15 = vadd.f32 %v297_v14, %v296_v13  ;;  %652 = vmatprep.subr.bf16.mxu1 %v931_v0  ;;  %p839_p11 = pnand %p838_p12, %p1267_p4  ;;  %s843_s8 = scalar_lea.vmem %s842_s25, 256 }
  0x7a   : > { %648 = vmatpush3.bf16.msra.mxu0 %v647_v12  ;;  %p844_p7 = scmp.lt.s32.totalorder %s1190_s9, %s842_s25  ;;  %p845_p10 = scmp.lt.s32.totalorder %s843_s8, %s837_s17 }
  0x7b   : > { %p840_p3 = pneg %p839_p11 }
  0x7c   : > { %654 = vmatpush3.bf16.msra.mxu1 %v653_v21  ;;  %p846_p8 = por %p845_p10, %p844_p7 }
  0x7d   : > { %630 = vmatmul.mubr.msk.f32.vlgmr.msra.gmra.mrb[0].mxu0 %vm293_vm1, %v298_v15 }
  0x7e   : > { %p847_p2 = pnand %p846_p8, %p840_p3 }
 0x150   : > { %v379_v23 = vpop.f32.mrb[0].mxu0 }
 0x151   : > { %v380_v24 = vadd.f32 %v602_v22, %v379_v23  ;;  %v631_v25 = vpop.f32.mrb[1].mxu0 }
 0x153   : > { %v604_v26 = vmul.f32 -1.442695, %v380_v24 }
 0x155   : > { %746 = vpow2.f32 %v604_v26 }
 0x15f   : > { %v747_v27 = vpop.eup %746 }
 0x160   : > { %v386_v28 = vadd.f32 1.0, %v747_v27 }
 0x162   : > { %748 = vrcp.f32 %v386_v28 }
 0x16c   : > { %v749_v29 = vpop.eup %748 }
 0x16d   : > { %v389_v30 = vmul.f32 %v749_v29, %v380_v24 }
 0x16f   : > { %641 = vmatmul.mubr.msk.f32.vlgmr.msra.gmra.mrb[0].mxu1 %vm293_vm1, %v389_v30 }
 0x242   : > { %v470_v32 = vpop.f32.mrb[0].mxu1 }
 0x243   : > { %v471_v33 = vadd.f32 %v605_v31, %v470_v32  ;;  %v642_v34 = vpop.f32.mrb[1].mxu1 }
 0x245   : > { %474 = vst [vmem:[%s289_s26] sm:$0xff] %v471_v33 }
 0x246   : > { %850 = shalt.err (!%p847_p2)
}
 0x247   : > { %s851_s24 = scalar_lea.hbm %s1188_s1, 128  ;;  %s855_s29 = scalar_lea.hbm %s1242_s5, 256 }
 0x248   : > { %p852_p0 = scmp.ne.s32.totalorder %s1188_s1, %s851_s24  ;;  %p856_p6 = scmp.lt.u32.totalorder %s1188_s1, %s1242_s5 }
 0x249   : > { %p857_p9 = scmp.lt.u32.totalorder %s855_s29, %s851_s24  ;;  %p859_p12 = scmp.lt.u32.totalorder %s851_s24, %s1188_s1 }
 0x24a   : > { %p853_p5 = pnand %p852_p0, %p1267_p4 }
 0x24b   : > { %p858_p13 = por %p857_p9, %p856_p6 }
 0x24c   : > { %p854_p1 = pneg %p853_p5 }
 0x24d   : > { %p860_p11 = por %p859_p12, %p858_p13 }
 0x24f   : > { %p861_p3 = pnand %p860_p11, %p854_p1 }
 0x251   : > { %864 = shalt.err (!%p861_p3)
}
 0x252   : > { %667 = dma.vmem_to_hbm [thread:$0]  (%p1267_p4), %s1190_s9, 128, %s1188_s1, %s476_s10  }
 0x253 PF: > { %s1268_s14 = sld [smem:[#allocation12_spill]]  ;;  %s502_s28 = sand.u32 1, %s903_s18  }
 0x254   : > { %p1269_p7 = scmp.ne.s32.totalorder %s1257_s6, 0  ;;  %s503_s26 = scalar_lea.sflag [#allocation4], %s502_s28 }
 0x259   : > { %p1270_p10 = scmp.ge.s32.totalorder %s1268_s14, 2 }
 0x25b   : > { %p681_p8 = pnand %p1270_p10, %p1269_p7 }
 0x25d   : > { %898 = dma.done.wait (!%p681_p8), %s503_s26, 128  }
 0x25e   : > { %900 = vsyncadd (!%p681_p8), %s503_s26, 4294967168  ;;  %s22_s23 = sadd.s32 1, %s1268_s14   ;;  %s1271_s18 = smov %s907_s19 }
 0x25f   : > { %p19_p2 = scmp.ge.s32.totalorder %s22_s23, 4   ;;  %s1272_s19 = smov %s911_s20 }
 0x260   : > { %s1273_s20 = smov %s1126_s11  ;;  %s1274_s21 = smov %s919_s22 }
 0x261   : > { %s1275_s22 = smov %s1277_s15  ;;  %21 = sbr.rel (!%p19_p2) target bundleno = 9 (0x9), region = 93 }
 0x268   :  { %508 = vsyncpa [#allocation3], 1 }
 0x269   :  { %510 = vsyncpa [#allocation3 + $0x1], 1 }
 0x26a   :  { %511 = vsyncpa [#allocation6], 1 }
 0x26b   :  { %512 = vsyncpa [#allocation4], 1 }
 0x26c   :  { %514 = vsyncpa [#allocation4 + $0x1], 1 }

</bundles_post_ra>
